<compile_context>
chip_gen: v7x
topology: tpu7x:2x2x1
jax: 0.10.0
libtpu: 0.0.40
codegen_flags: <defaults>
</compile_context>

<pallas_src>
import functools
import math

import jax
import jax.numpy as jnp
from jax.experimental import pallas as pl
from jax.experimental.pallas import tpu as pltpu

# settings.kl_weight / settings.entropy_weight are external globals in the
# original repo; fixed here as deterministic synthetic constants.
KL_WEIGHT = 1.0
ENTROPY_WEIGHT = 0.1
TAU = 1.0
EPS = 1e-6


def _vq_kernel(lat_ref, gum_ref, proto_ref, p2_ref,
               quant_ref, psum_ref, lpsum_ref):
    x = lat_ref[...].astype(jnp.float32)        # (TB, D)  streamed batch tile
    p = proto_ref[...].astype(jnp.float32)      # (K, D)   resident
    g = gum_ref[...].astype(jnp.float32)        # (TB, K)  streamed Gumbel noise
    p2 = p2_ref[...].astype(jnp.float32)        # (1, K)   resident |p_k|^2

    tb = x.shape[0]
    k = p.shape[0]

    # -dists[b,k] = -|x_b|^2 + 2 x_b.p_k - |p_k|^2 ; the |x|^2 term is a
    # per-row constant (softmax and argmax invariant) so it is dropped.
    dims = (((1,), (1,)), ((), ()))  # contract last dim of both operands
    xp = jax.lax.dot_general(x.astype(jnp.bfloat16), p.astype(jnp.bfloat16),
                             dims, preferred_element_type=jnp.float32)  # (TB,K)
    logits = (2.0 * xp - p2 + g) / TAU                                   # (TB,K)

    # One exp pass feeds the softmax normalizer, probs, and the logprob sum.
    m = jnp.max(logits, axis=1, keepdims=True)                           # (TB,1)
    z = logits - m
    ez = jnp.exp(z)                                                      # (TB,K)
    s = jnp.sum(ez, axis=1, keepdims=True)                               # (TB,1)
    probs = ez * (1.0 / s)                                               # (TB,K)

    # Hard argmax one-hot (straight-through forward value).
    lane = jax.lax.broadcasted_iota(jnp.int32, (tb, k), 1)
    idx = jnp.min(jnp.where(logits >= m, lane, k), axis=1, keepdims=True)
    onehot = (lane == idx).astype(jnp.float32)                           # (TB,K)

    # Quantized latents = onehot @ prototypes (MXU, f32 for exact proto rows).
    quant_ref[...] = jnp.dot(onehot, p,
                             preferred_element_type=jnp.float32
                             ).astype(quant_ref.dtype)

    # Per-tile loss partials, reduced in the JAX wrapper:
    #   psum  = sum_b probs[b, :]                    (true-prior column sums)
    #   lpsum = sum_{b,k} logprobs = sum(z) - K*sum_b log(s_b)
    psum_ref[...] = jnp.sum(probs, axis=0, keepdims=True)                # (1,K)
    lpsum_ref[...] = (jnp.sum(z, keepdims=True)
                      - float(k) * jnp.sum(jnp.log(s), keepdims=True))   # (1,1)


def _pick_tile_b(batch):
    for tb in (512, 256, 128, 64, 32, 16, 8):
        if batch % tb == 0:
            return tb
    # TODO(synk): pad B to a multiple of 8 and mask the padded rows out of the
    # loss partials; at small/irregular B a single full block is fine.
    return batch


@functools.partial(jax.jit, static_argnames=("tile_b",))
def vq_layer_forward(latents, prototypes, gumbel, *, tile_b=None):
    """Returns (quantized_latents, total_loss, capacity) like VQLayer.forward."""
    B, D = latents.shape
    K = prototypes.shape[0]
    if tile_b is None:
        tile_b = _pick_tile_b(B)
    assert B % tile_b == 0
    n_tiles = B // tile_b
    # TODO(synk): at production sizes pad D to a multiple of 128 so the quant
    # writeback is lane-dense, and halve tile_b on v7x (64 MiB VMEM vs 128).

    # Grid-invariant prototype norms: computed once per call, resident in VMEM.
    p2 = jnp.sum(jnp.square(prototypes.astype(jnp.float32)), axis=1)[None, :]

    # Generation-aware-ish VMEM budget with headroom (clamped well under v7x's
    # 64 MiB physical VMEM; raises v5e's 16 MiB scoped default).
    per_tile_bytes = 4 * (2 * 2 * tile_b * D      # latents in + quant out (dbl-buf)
                          + 2 * tile_b * K        # gumbel in (dbl-buf)
                          + K * D + K             # resident protos + |p|^2
                          + 8 * tile_b * K)       # logits/probs intermediates
    vmem_limit = int(min(max(4 * per_tile_bytes, 32 * 1024 * 1024),
                         48 * 1024 * 1024))

    cost = pl.CostEstimate(
        flops=2 * 2 * B * K * D,                  # distance + quantize matmuls
        transcendentals=B * (K + 2),              # exp per logit + log per row
        bytes_accessed=4 * (2 * B * D + B * K + K * D + K + n_tiles * (K + 1)),
    )

    quant, psum, lpsum = pl.pallas_call(
        _vq_kernel,
        grid=(n_tiles,),
        in_specs=[
            pl.BlockSpec((tile_b, D), lambda i: (i, 0)),   # latents   (streamed)
            pl.BlockSpec((tile_b, K), lambda i: (i, 0)),   # gumbel    (streamed)
            pl.BlockSpec((K, D), lambda i: (0, 0)),        # prototypes (resident)
            pl.BlockSpec((1, K), lambda i: (0, 0)),        # |p|^2      (resident)
        ],
        out_specs=(
            pl.BlockSpec((tile_b, D), lambda i: (i, 0)),   # quantized latents
            pl.BlockSpec((1, K), lambda i: (i, 0)),        # per-tile prob col-sums
            pl.BlockSpec((1, 1), lambda i: (i, 0)),        # per-tile logprob sums
        ),
        out_shape=(
            jax.ShapeDtypeStruct((B, D), jnp.float32),
            jax.ShapeDtypeStruct((n_tiles, K), jnp.float32),
            jax.ShapeDtypeStruct((n_tiles, 1), jnp.float32),
        ),
        compiler_params=pltpu.CompilerParams(
            dimension_semantics=("parallel",),
            vmem_limit_bytes=vmem_limit,
        ),
        cost_estimate=cost,
    )(latents, gumbel, prototypes, p2)

    # Tiny epilogue reductions over the per-tile partials (O(n_tiles * K)).
    capacity = -math.log(K) - jnp.sum(lpsum) / (B * K)
    true_prior = jnp.sum(psum, axis=0) / B + EPS           # (K,)
    ent = jnp.sum(-true_prior * jnp.log(true_prior))
    total_loss = KL_WEIGHT * (capacity + ENTROPY_WEIGHT * ent)
    return quant, total_loss, capacity


if __name__ == "__main__":
    B, D, K = 8, 32, 16  # batch, latent_dim, num_protos

    key = jax.random.PRNGKey(0)
    k_lat, k_proto, k_gum = jax.random.split(key, 3)

    latents = jax.random.normal(k_lat, (B, D), dtype=jnp.float32)
    # prototypes.data.uniform_(-1/num_protos, 1/num_protos)
    prototypes = jax.random.uniform(
        k_proto, (K, D), minval=-1.0 / K, maxval=1.0 / K, dtype=jnp.float32)
    # Gumbel noise drawn in the wrapper (portable; no HW-PRNG dependency).
    gumbel = jax.random.gumbel(k_gum, (B, K), dtype=jnp.float32)

    quant, total_loss, capacity = vq_layer_forward(latents, prototypes, gumbel)
    jax.block_until_ready((quant, total_loss, capacity))
    assert quant.shape == (B, D)
    assert bool(jnp.isfinite(total_loss)) and bool(jnp.isfinite(capacity))
    print("KERNEL_OK")
</pallas_src>

<mosaic_0001>
module attributes {stable_mosaic.version = 11 : i64} {
  func.func @_vq_kernel(%arg0: i32, %arg1: memref<8x32xf32, #tpu.memory_space<vmem>>, %arg2: memref<8x16xf32, #tpu.memory_space<vmem>>, %arg3: memref<16x32xf32, #tpu.memory_space<vmem>>, %arg4: memref<1x16xf32, #tpu.memory_space<vmem>>, %arg5: memref<8x32xf32, #tpu.memory_space<vmem>>, %arg6: memref<1x16xf32, #tpu.memory_space<vmem>>, %arg7: memref<1x1xf32, #tpu.memory_space<vmem>>) attributes {dimension_semantics = [#tpu.dimension_semantics<parallel>], iteration_bounds = array<i64: 1>, scalar_prefetch = 0 : i64, scratch_operands = 0 : i64, tpu.core_type = #tpu.core_type<tc>, window_params = [{transform_indices = @transform_0, window_bounds = array<i64: 8, 32>}, {transform_indices = @transform_1, window_bounds = array<i64: 8, 16>}, {pipeline_mode = #tpu.pipeline_mode<synchronous>, transform_indices = @transform_2, window_bounds = array<i64: 16, 32>}, {pipeline_mode = #tpu.pipeline_mode<synchronous>, transform_indices = @transform_3, window_bounds = array<i64: 1, 16>}, {transform_indices = @transform_4, window_bounds = array<i64: 8, 32>}, {transform_indices = @transform_5, window_bounds = array<i64: 1, 16>}, {transform_indices = @transform_6, window_bounds = array<i64: 1, 1>}]} {
    %c0 = arith.constant 0 : index
    %c0_0 = arith.constant 0 : index
    %0 = vector.load %arg1[%c0, %c0_0] : memref<8x32xf32, #tpu.memory_space<vmem>>, vector<8x32xf32>
    %c0_1 = arith.constant 0 : index
    %c0_2 = arith.constant 0 : index
    %1 = vector.load %arg3[%c0_1, %c0_2] : memref<16x32xf32, #tpu.memory_space<vmem>>, vector<16x32xf32>
    %c0_3 = arith.constant 0 : index
    %c0_4 = arith.constant 0 : index
    %2 = vector.load %arg2[%c0_3, %c0_4] : memref<8x16xf32, #tpu.memory_space<vmem>>, vector<8x16xf32>
    %c0_5 = arith.constant 0 : index
    %c0_6 = arith.constant 0 : index
    %3 = vector.load %arg4[%c0_5, %c0_6] : memref<1x16xf32, #tpu.memory_space<vmem>>, vector<1x16xf32>
    %4 = arith.truncf %0 : vector<8x32xf32> to vector<8x32xbf16>
    %5 = arith.truncf %1 : vector<16x32xf32> to vector<16x32xbf16>
    %cst = arith.constant dense<0.000000e+00> : vector<8x16xf32>
    %6 = tpu.matmul %4, %5, %cst {dimension_numbers = #tpu.dot_dimension_numbers<[1], [1], [0], [0], [0, 0, 1, 0], [], []>} : vector<8x32xbf16>, vector<16x32xbf16>, vector<8x16xf32> -> vector<8x16xf32>
    %cst_7 = arith.constant 2.000000e+00 : f32
    %7 = vector.broadcast %cst_7 : f32 to vector<8x16xf32>
    %8 = arith.mulf %7, %6 : vector<8x16xf32>
    %9 = vector.broadcast %3 : vector<1x16xf32> to vector<8x16xf32>
    %10 = arith.subf %8, %9 : vector<8x16xf32>
    %11 = arith.addf %10, %2 : vector<8x16xf32>
    %cst_8 = arith.constant 1.000000e+00 : f32
    %12 = vector.broadcast %cst_8 : f32 to vector<8x16xf32>
    %13 = arith.divf %11, %12 : vector<8x16xf32>
    %cst_9 = arith.constant dense<0xFF800000> : vector<8xf32>
    %14 = vector.multi_reduction <maximumf>, %13, %cst_9 [1] : vector<8x16xf32> to vector<8xf32>
    %15 = vector.shape_cast %14 : vector<8xf32> to vector<8x1xf32>
    %16 = vector.broadcast %15 : vector<8x1xf32> to vector<8x16xf32>
    %17 = arith.subf %13, %16 : vector<8x16xf32>
    %18 = math.exp %17 : vector<8x16xf32>
    %cst_10 = arith.constant dense<0.000000e+00> : vector<8xf32>
    %19 = vector.multi_reduction <add>, %18, %cst_10 [1] : vector<8x16xf32> to vector<8xf32>
    %20 = vector.shape_cast %19 : vector<8xf32> to vector<8x1xf32>
    %cst_11 = arith.constant 1.000000e+00 : f32
    %21 = vector.broadcast %cst_11 : f32 to vector<8x1xf32>
    %22 = arith.divf %21, %20 : vector<8x1xf32>
    %23 = vector.broadcast %22 : vector<8x1xf32> to vector<8x16xf32>
    %24 = arith.mulf %18, %23 : vector<8x16xf32>
    %25 = tpu.iota {dimensions = array<i32: 1>} : vector<8x16xi32>
    %26 = vector.broadcast %15 : vector<8x1xf32> to vector<8x16xf32>
    %27 = arith.cmpf oge, %13, %26 : vector<8x16xf32>
    %c16_i32 = arith.constant 16 : i32
    %28 = vector.broadcast %c16_i32 : i32 to vector<8x16xi32>
    %29 = arith.select %27, %25, %28 : vector<8x16xi1>, vector<8x16xi32>
    %cst_12 = arith.constant dense<2147483647> : vector<8xi32>
    %30 = vector.multi_reduction <minsi>, %29, %cst_12 [1] : vector<8x16xi32> to vector<8xi32>
    %31 = vector.shape_cast %30 : vector<8xi32> to vector<8x1xi32>
    %32 = vector.broadcast %31 : vector<8x1xi32> to vector<8x16xi32>
    %33 = arith.cmpi eq, %25, %32 : vector<8x16xi32>
    %34 = arith.extui %33 : vector<8x16xi1> to vector<8x16xi32>
    %35 = arith.sitofp %34 : vector<8x16xi32> to vector<8x16xf32>
    %cst_13 = arith.constant dense<0.000000e+00> : vector<8x32xf32>
    %36 = tpu.matmul %35, %1, %cst_13 {dimension_numbers = #tpu.dot_dimension_numbers<[1], [0], [0], [1], [0, 0, 1, 1], [], []>} : vector<8x16xf32>, vector<16x32xf32>, vector<8x32xf32> -> vector<8x32xf32>
    %c0_14 = arith.constant 0 : index
    %c0_15 = arith.constant 0 : index
    %37 = vector.load %arg5[%c0_14, %c0_15] : memref<8x32xf32, #tpu.memory_space<vmem>>, vector<8x32xf32>
    tpu.vector_store %arg5[%c0_14, %c0_15], %36 {strides = array<i32>} : memref<8x32xf32, #tpu.memory_space<vmem>>, vector<8x32xf32>,
    %cst_16 = arith.constant dense<0.000000e+00> : vector<16xf32>
    %38 = vector.multi_reduction <add>, %24, %cst_16 [0] : vector<8x16xf32> to vector<16xf32>
    %39 = vector.shape_cast %38 : vector<16xf32> to vector<1x16xf32>
    %c0_17 = arith.constant 0 : index
    %c0_18 = arith.constant 0 : index
    %40 = vector.load %arg6[%c0_17, %c0_18] : memref<1x16xf32, #tpu.memory_space<vmem>>, vector<1x16xf32>
    tpu.vector_store %arg6[%c0_17, %c0_18], %39 {strides = array<i32>} : memref<1x16xf32, #tpu.memory_space<vmem>>, vector<1x16xf32>,
    %41 = vector.shape_cast %17 : vector<8x16xf32> to vector<1x8x16xf32>
    %cst_19 = arith.constant dense<0.000000e+00> : vector<1xf32>
    %42 = vector.multi_reduction <add>, %41, %cst_19 [1, 2] : vector<1x8x16xf32> to vector<1xf32>
    %43 = vector.shape_cast %42 : vector<1xf32> to vector<1x1x1xf32>
    %44 = vector.extract %43[0, 0, 0] : f32 from vector<1x1x1xf32>
    %45 = vector.broadcast %44 : f32 to vector<1x1xf32>
    %46 = math.log %20 : vector<8x1xf32>
    %47 = vector.shape_cast %46 : vector<8x1xf32> to vector<1x8x1xf32>
    %cst_20 = arith.constant dense<0.000000e+00> : vector<1xf32>
    %48 = vector.multi_reduction <add>, %47, %cst_20 [1, 2] : vector<1x8x1xf32> to vector<1xf32>
    %49 = vector.shape_cast %48 : vector<1xf32> to vector<1x1x1xf32>
    %50 = vector.extract %49[0, 0, 0] : f32 from vector<1x1x1xf32>
    %51 = vector.broadcast %50 : f32 to vector<1x1xf32>
    %cst_21 = arith.constant 1.600000e+01 : f32
    %52 = vector.broadcast %cst_21 : f32 to vector<1x1xf32>
    %53 = arith.mulf %52, %51 : vector<1x1xf32>
    %54 = arith.subf %45, %53 : vector<1x1xf32>
    %c0_22 = arith.constant 0 : index
    %c0_23 = arith.constant 0 : index
    %55 = vector.load %arg7[%c0_22, %c0_23] : memref<1x1xf32, #tpu.memory_space<vmem>>, vector<1x1xf32>
    tpu.vector_store %arg7[%c0_22, %c0_23], %54 {strides = array<i32>} : memref<1x1xf32, #tpu.memory_space<vmem>>, vector<1x1xf32>,
    return
  }
  func.func @transform_0(%arg0: i32) -> (i32, i32) {
    %c0_i32 = arith.constant 0 : i32
    %c0_i32_0 = arith.constant 0 : i32
    return %arg0, %c0_i32 : i32, i32
  }
  func.func @transform_1(%arg0: i32) -> (i32, i32) {
    %c0_i32 = arith.constant 0 : i32
    %c0_i32_0 = arith.constant 0 : i32
    return %arg0, %c0_i32 : i32, i32
  }
  func.func @transform_2(%arg0: i32) -> (i32, i32) {
    %c0_i32 = arith.constant 0 : i32
    %c0_i32_0 = arith.constant 0 : i32
    %c0_i32_1 = arith.constant 0 : i32
    return %c0_i32, %c0_i32_0 : i32, i32
  }
  func.func @transform_3(%arg0: i32) -> (i32, i32) {
    %c0_i32 = arith.constant 0 : i32
    %c0_i32_0 = arith.constant 0 : i32
    %c0_i32_1 = arith.constant 0 : i32
    return %c0_i32, %c0_i32_0 : i32, i32
  }
  func.func @transform_4(%arg0: i32) -> (i32, i32) {
    %c0_i32 = arith.constant 0 : i32
    %c0_i32_0 = arith.constant 0 : i32
    return %arg0, %c0_i32 : i32, i32
  }
  func.func @transform_5(%arg0: i32) -> (i32, i32) {
    %c0_i32 = arith.constant 0 : i32
    %c0_i32_0 = arith.constant 0 : i32
    return %arg0, %c0_i32 : i32, i32
  }
  func.func @transform_6(%arg0: i32) -> (i32, i32) {
    %c0_i32 = arith.constant 0 : i32
    %c0_i32_0 = arith.constant 0 : i32
    return %arg0, %c0_i32 : i32, i32
  }
}

</mosaic_0001>

<bundles_post_ra>
// kernel: vq_layer_forward.1
= control target key start
LH: loop header
LB: loop body
LE: loop exit
PB: predicated region body
PF: predicated region fallthrough
CT: control target
= control target key end

     0   :  { %12 = vsyncpa [#allocation3], 0  ;;  %s496_s0 = inlined_call_operand.vmem [shape: f32[8,32], index: 0, kind: input, shape index: {}]   ;;  %s497_s1 = inlined_call_operand.hbm [shape: f32[8,16], index: 1, kind: input, shape index: {}]   ;;  %s498_s2 = inlined_call_operand.vmem [shape: f32[16,32], index: 2, kind: input, shape index: {}]   ;;  %s499_s3 = inlined_call_operand.vmem [shape: f32[1,16], index: 3, kind: input, shape index: {}]   ;;  %s500_s4 = inlined_call_operand.hbm [shape: f32[8,32], index: 4, kind: output, shape index: {0}]   ;;  %s501_s5 = inlined_call_operand.vmem [shape: f32[1,16], index: 5, kind: output, shape index: {1}]   ;;  %s502_s6 = inlined_call_operand.hbm [shape: f32[1,1], index: 6, kind: output, shape index: {2}]  }
   0x1   :  { %13 = vsyncpa [#allocation4], 0 }
   0x2   :  { %14 = vsyncpa [#allocation7], 0  ;;  %s391_s21 = smov [#allocation2]   ;;  %s319_s25 = scalar_lea.hbm %s497_s1, 128 }
   0x3   :  { %s23_s22 = sshll.u32 %s391_s21, 4  ;;  %p320_p0 = scmp.ne.s32.totalorder %s497_s1, %s319_s25  ;;  %s24_s22 = int_to_ptr.vmem [resolvable:$true] %s23_s22 }
   0x4   :  { %p323_p1 = scmp.lt.u32.totalorder %s319_s25, %s497_s1 }
   0x6   :  { %p325_p2 = pnand %p323_p1, %p320_p0 }
   0x8   :  { %328 = shalt.err (!%p325_p2)
}
   0x9   :  { %s329_s30 = scalar_lea.vmem %s24_s22, 128  ;;  %p334_p4 = scmp.lt.s32.totalorder %s24_s22, %s24_s22 }
   0xa   :  { %p330_p3 = scmp.ne.s32.totalorder %s24_s22, %s329_s30  ;;  %p335_p5 = scmp.lt.s32.totalorder %s329_s30, %s329_s30 }
   0xc   :  { %p336_p6 = por %p335_p5, %p334_p4 }
   0xe   :  { %p337_p7 = pnand %p336_p6, %p330_p3 }
  0x10   :  { %340 = shalt.err (!%p337_p7)
}
  0x11   :  { %26 = dma.hbm_to_vmem [thread:$0]  %s497_s1, 128, %s24_s22, [#allocation3]  }
  0x12   :  { %385 = dma.done.wait [#allocation3], 128  }
  0x13   :  { %386 = vsyncadd [#allocation3], 4294967168  ;;  %v392_v0 = vmov 0.0   ;;  %vm393_vm0 = vmmov 0   ;;  %v36_v1 = vld [vmem:[%s498_s2] sm:$0xff]  ;;  %v37_v2 = vld [vmem:[%s498_s2 + $0x8] sm:$0xff]  ;;  %v111_v17 = vlaneseq }
  0x14   :  { %287 = vmatprep.subr.bf16.mxu0 %v392_v0  ;;  %289 = vmatprep.mubr.msk.bf16.mxu0 %vm393_vm0, %v392_v0  ;;  %vm42_vm1 = vcmask 261120   ;;  %v41_v3 = vpack.c.bf16 %v37_v2, %v36_v1  ;;  %v35_v5 = vld [vmem:[%s496_s0] sm:$0xff]  ;;  %vm98_vm2 = vcmask 130048   ;;  %v394_v40 = vmov 0.0|0.0  }
  0x15   :  { %297 = vmatprep.mubr.msk.f32.mxu1 %vm393_vm0, %v392_v0  ;;  %v40_v6 = vpack.c.bf16 %v35_v5, %v35_v5  ;;  %v279_v7 = vld [vmem:[%s499_s3] ss:$0 sm:$0xff]  ;;  %v112_v18 = vand.u32 127, %v111_v17  ;;  %300 = vmatprep.subr.bf16.mxu1 %v394_v40  ;;  %vm229_vm6 = vcmask 7168   ;;  %vm214_vm7 = vcmask 122880   ;;  %s395_s3 = smov [#allocation5]  }
  0x16   :  { %v47_v4 = vsel %vm42_vm1, %v41_v3, 0  ;;  %v38_v12 = vld [vmem:[#allocation2] sm:$0xff]  ;;  %302 = vmatpush3.bf16.msra.mxu1 %v41_v3  ;;  %s251_s16 = sshll.u32 %s395_s3, 4  ;;  %s252_s16 = int_to_ptr.vmem [resolvable:$true] %s251_s16 }
  0x17   :  { %288 = vmatpush3.bf16.xpose.msra.mxu0 %v47_v4  ;;  %s341_s17 = scalar_lea.vmem %s252_s16, 128  ;;  %p346_p9 = scmp.lt.s32.totalorder %s252_s16, %s252_s16 }
  0x18   :  { %p342_p8 = scmp.ne.s32.totalorder %s252_s16, %s341_s17  ;;  %p347_p10 = scmp.lt.s32.totalorder %s341_s17, %s341_s17 }
  0x1a   :  { %p348_p11 = por %p347_p10, %p346_p9 }
  0x1c   :  { %p349_p12 = pnand %p348_p11, %p342_p8 }
  0x1e   :  { %290 = vmatmul.mubr.msk.bf16.vlgmr.msra.gmra.mrb[0].mxu0 %vm42_vm1, %v40_v6 }
  0xf1   :  { %v83_v8 = vpop.f32.mrb[0].mxu0 }
  0xf2   :  { %v89_v9 = vmul.f32 2.0, %v83_v8  ;;  %v291_v10 = vpop.f32.mrb[1].mxu0 }
  0xf3   :  { %v86_v11 = vpop.f32.mrb[2].mxu0 }
  0xf4   :  { %v96_v13 = vsub.f32 %v89_v9, %v279_v7  ;;  %v292_v14 = vpop.f32.mrb[3].mxu0 }
  0xf6   :  { %v97_v15 = vadd.f32 %v96_v13, %v38_v12 }
  0xf8   :  { %v99_v16 = vsel %vm98_vm2, %v97_v15, -inf }
  0xf9   :  { %100 = vmax.xlane.f32.xlu0 %v99_v16 }
 0x186   :  { %v101_v19 = vpop.xlane.xlu0 %100 }
 0x187   :  { %vm113_vm3 = vcmp.ge.f32.partialorder %v97_v15, %v101_v19  ;;  %v102_v24 = vsub.f32 %v97_v15, %v101_v19 }
 0x188   :  { %v114_v20 = vsel %vm113_vm3, %v112_v18, 16 }
 0x189   :  { %v115_v21 = vsel %vm98_vm2, %v114_v20, 2147483647  ;;  %v216_v25 = vsel %vm98_vm2, %v102_v24, 0.0  ;;  %v103_v26 = vmul.f32 1.442695, %v102_v24 }
 0x18a   :  { %v117_v22 = vshra.s32 %v115_v21, 16  ;;  %v116_v27 = vand.u32 65535, %v115_v21 }
 0x18b   :  { %313 = vpow2.f32 %v103_v26 }
 0x18c   :  { %v119_v23 = vcvt.s32.f32 %v117_v22  ;;  %v118_v29 = vcvt.s32.f32 %v116_v27 }
 0x18e   :  { %120 = vmin.xlane.f32.xlu0 %v119_v23 }
 0x192   :  { %217 = vadd.xlane.f32.xlu0 %v216_v25 }
 0x195   :  { %v314_v31 = vpop.eup %313 }
 0x196   :  { %v105_v34 = vsel %vm98_vm2, %v314_v31, 0.0 }
 0x21b   :  { %v121_v28 = vpop.xlane.xlu0 %120 }
 0x21c   :  { %vm122_vm4 = vcmp.eq.f32.partialorder %v119_v23, %v121_v28  ;;  %v127_v41 = vcvt.f32.s32 %v121_v28 }
 0x21d   :  { %v123_v30 = vsel %vm122_vm4, %v118_v29, inf }
 0x21e   :  { %124 = vmin.xlane.f32.xlu1 %v123_v30  ;;  %v128_v43 = vshll.u32 %v127_v41, 16 }
 0x21f   :  { %v218_v32 = vpop.xlane.xlu0 %217 }
 0x220   :  { %v219_v33 = vrot.slane %v218_v32, 4 }
 0x222   :  { %v220_v35 = vadd.f32 %v219_v33, %v218_v32  ;;  %106 = vadd.xlane.f32.xlu1 %v105_v34 }
 0x224   :  { %v221_v36 = vrot.slane %v220_v35, 2 }
 0x226   :  { %v222_v37 = vadd.f32 %v221_v36, %v220_v35 }
 0x228   :  { %v223_v38 = vrot.slane %v222_v37, 1 }
 0x22a   :  { %v224_v39 = vadd.f32 %v223_v38, %v222_v37 }
 0x22c   :  { %303 = vpush %v224_v39 }
 0x2ab   :  { %v125_v42 = vpop.xlane.xlu1 %124 }
 0x2ac   :  { %v126_v44 = vcvt.f32.s32 %v125_v42 }
 0x2ae   :  { %v129_v45 = vadd.s32 %v128_v43, %v126_v44 }
 0x2af   :  { %v107_v46 = vpop.xlane.xlu1 %106 }
 0x2b0   :  { %315 = vrcp.f32 %v107_v46  ;;  %vm130_vm5 = vcmp.eq.s32.totalorder %v112_v18, %v129_v45 }
 0x2b1   :  { %317 = vlog2.f32 %v107_v46  ;;  %v280_v47 = vsel %vm130_vm5, 1.0, %v392_v0 }
 0x2b2   :  { %298 = vmatmul.mubr.msk.f32.vlgmr.msra.gmra.mrb[0].mxu1 %vm98_vm2, %v280_v47 }
 0x2ba   :  { %v316_v48 = vpop.eup %315 }
 0x2bb   :  { %v318_v49 = vpop.eup %317  ;;  %v110_v50 = vmul.f32 %v316_v48, %v314_v31 }
 0x2bc   :  { %v228_v51 = vmul.f32 0.6931472, %v318_v49 }
 0x2bd   :  { %v207_v52 = vsel %vm98_vm2, %v110_v50, 0.0 }
 0x2be   :  { %v208_v53 = vrot.slane %v207_v52, 4  ;;  %v230_v54 = vsel %vm229_vm6, %v228_v51, 0.0 }
 0x2bf   :  { %231 = vadd.xlane.f32.xlu1 %v230_v54 }
 0x2c0   :  { %v209_v55 = vadd.f32 %v208_v53, %v207_v52 }
 0x2c2   :  { %v210_v56 = vrot.slane %v209_v55, 2 }
 0x2c4   :  { %v211_v57 = vadd.f32 %v210_v56, %v209_v55 }
 0x2c6   :  { %v212_v58 = vrot.slane %v211_v57, 1 }
 0x2c8   :  { %v213_v59 = vadd.f32 %v212_v58, %v211_v57 }
 0x2ca   :  { %215 = vst.msk [vmem:[%s501_s5] sm:$0x1] %vm214_vm7, %v213_v59 }
 0x34c   :  { %v232_v60 = vpop.xlane.xlu1 %231 }
 0x34d   :  { %v233_v61 = vrot.slane %v232_v60, 4 }
 0x34f   :  { %v234_v62 = vadd.f32 %v233_v61, %v232_v60 }
 0x351   :  { %v235_v63 = vrot.slane %v234_v62, 2 }
 0x353   :  { %v236_v0 = vadd.f32 %v235_v63, %v234_v62 }
 0x355   :  { %v237_v1 = vrot.slane %v236_v0, 1 }
 0x357   :  { %v238_v2 = vadd.f32 %v237_v1, %v236_v0 }
 0x359   :  { %305 = vpush %v238_v2 }
 0x385   :  { %v202_v3 = vpop.f32.mrb[0].mxu1 }
 0x386   :  { %206 = vst.msk [vmem:[#allocation5] sm:$0xff] %vm42_vm1, %v202_v3  ;;  %v299_v4 = vpop.f32.mrb[1].mxu1 }
 0x387   :  { %352 = shalt.err (!%p349_p12)
}
 0x388   :  { %s353_s19 = scalar_lea.hbm %s500_s4, 128 }
 0x389   :  { %p354_p13 = scmp.ne.s32.totalorder %s500_s4, %s353_s19  ;;  %p357_p0 = scmp.lt.u32.totalorder %s353_s19, %s500_s4 }
 0x38b   :  { %p359_p1 = pnand %p357_p0, %p354_p13 }
 0x38d   :  { %362 = shalt.err (!%p359_p1)
}
 0x38e   :  { %254 = dma.vmem_to_hbm [thread:$0]  %s252_s16, 128, %s500_s4, [#allocation4]   ;;  %vm243_vm8 = vcmask 0  }
 0x38f   :  { %s304_s26 = spop %303  ;;  %s396_s28 = smov [#allocation6]  }
 0x390   :  { %s306_s27 = spop %305  ;;  %s263_s29 = sshll.u32 %s396_s28, 4  ;;  %v226_v7 = vstv %s304_s26  ;;  %s264_s29 = int_to_ptr.vmem [resolvable:$true] %s263_s29 }
 0x391   :  { %v240_v5 = vstv %s306_s27  ;;  %s363_s30 = scalar_lea.vmem %s264_s29, 16  ;;  %s367_s7 = scalar_lea.vmem %s264_s29, 32 }
 0x392   :  { %v241_v6 = vmul.f32 16.0, %v240_v5  ;;  %p364_p2 = scmp.ne.s32.totalorder %s264_s29, %s363_s30  ;;  %p368_p3 = scmp.lt.s32.totalorder %s264_s29, %s264_s29 }
 0x393   :  { %p369_p4 = scmp.lt.s32.totalorder %s367_s7, %s363_s30 }
 0x394   :  { %v242_v8 = vsub.f32 %v226_v7, %v241_v6 }
 0x395   :  { %p370_p5 = por %p369_p4, %p368_p3 }
 0x396   :  { %244 = vst.msk [vmem:[#allocation6] sm:$0x1] %vm243_vm8, %v242_v8 }
 0x397   :  { %p371_p6 = pnand %p370_p5, %p364_p2 }
 0x399   :  { %374 = shalt.err (!%p371_p6)
}
 0x39a   :  { %s375_s9 = scalar_lea.hbm %s502_s6, 16 }
 0x39b   :  { %p376_p7 = scmp.ne.s32.totalorder %s502_s6, %s375_s9  ;;  %p379_p8 = scmp.lt.u32.totalorder %s375_s9, %s502_s6 }
 0x39d   :  { %p381_p9 = pnand %p379_p8, %p376_p7 }
 0x39f   :  { %384 = shalt.err (!%p381_p9)
}
 0x3a0   :  { %266 = dma.vmem_to_hbm [thread:$0]  %s264_s29, 16, %s502_s6, [#allocation7]  }
 0x3a1   :  { %387 = dma.done.wait [#allocation4], 128  }
 0x3a2   :  { %388 = vsyncadd [#allocation4], 4294967168 }
 0x3a3   :  { %389 = dma.done.wait [#allocation7], 16  }
 0x3a4   :  { %390 = vsyncadd [#allocation7], 4294967280 }
 0x3a5   :  { %275 = vsyncpa [#allocation3], 1 }
 0x3a6   :  { %276 = vsyncpa [#allocation4], 1 }
 0x3a7   :  { %277 = vsyncpa [#allocation7], 1 }

</bundles_post_ra>
